<compile_context>
chip_gen: v7x
topology: tpu7x:2x2x1
jax: 0.10.0
libtpu: 0.0.40
codegen_flags: <defaults>
</compile_context>

<pallas_src>
import functools

import jax
import jax.numpy as jnp
import numpy as np
from jax.experimental import pallas as pl
from jax.experimental.pallas import tpu as pltpu

LANE = 128


def _round_up(x, m):
    return (x + m - 1) // m * m


def _pad2(a, rows, cols, dtype=None):
    out = jnp.pad(a, ((0, rows - a.shape[0]), (0, cols - a.shape[1])))
    return out if dtype is None else out.astype(dtype)


# ------------------------------------------------------------------ kernels --

def transform_kernel(x_ref, w_ref, out_ref):
    """out = x @ w  (feature transform, computed once per layer)."""
    out_ref[...] = jnp.dot(
        x_ref[...].astype(jnp.float32),
        w_ref[...],
        preferred_element_type=jnp.float32,
    ).astype(out_ref.dtype)


def aggregate_kernel(a_ref, xw_ref, b_ref, out_ref, acc_ref, *, apply_relu):
    """out[i] = act( sum_k A[i,k] @ XW[k] + b ) with an f32 VMEM accumulator."""
    k = pl.program_id(1)

    @pl.when(k == 0)
    def _():
        acc_ref[...] = jnp.zeros_like(acc_ref)

    acc_ref[...] += jnp.dot(
        a_ref[...], xw_ref[...], preferred_element_type=jnp.float32
    )

    @pl.when(k == pl.num_programs(1) - 1)
    def _():
        r = acc_ref[...] + b_ref[...]
        if apply_relu:
            r = jnp.maximum(r, 0.0)
        out_ref[...] = r.astype(out_ref.dtype)


# ----------------------------------------------------------------- wrappers --

def _transform(x, w, *, tm, out_dtype):
    n_p, f_in_p = x.shape
    f_out_p = w.shape[1]
    out_isz = np.dtype(out_dtype).itemsize
    vmem = (2 * (tm * f_in_p * x.dtype.itemsize + tm * f_out_p * out_isz)
            + f_in_p * f_out_p * w.dtype.itemsize + (4 << 20))
    return pl.pallas_call(
        transform_kernel,
        out_shape=jax.ShapeDtypeStruct((n_p, f_out_p), out_dtype),
        grid_spec=pltpu.PrefetchScalarGridSpec(
            num_scalar_prefetch=0,
            grid=(n_p // tm,),
            in_specs=[
                pl.BlockSpec((tm, f_in_p), lambda i: (i, 0)),
                pl.BlockSpec((f_in_p, f_out_p), lambda i: (0, 0)),  # resident W
            ],
            out_specs=pl.BlockSpec((tm, f_out_p), lambda i: (i, 0)),
        ),
        compiler_params=pltpu.CompilerParams(
            dimension_semantics=("parallel",),
            vmem_limit_bytes=int(vmem),
        ),
        cost_estimate=pl.CostEstimate(
            flops=2 * n_p * f_in_p * f_out_p,
            transcendentals=0,
            bytes_accessed=(n_p * f_in_p * x.dtype.itemsize
                            + f_in_p * f_out_p * w.dtype.itemsize
                            + n_p * f_out_p * out_isz),
        ),
    )(x, w)


def _aggregate(a, xw, b, *, tm, tk, apply_relu, out_dtype):
    n_p = a.shape[0]
    f_out_p = xw.shape[1]
    out_isz = np.dtype(out_dtype).itemsize
    # Double-buffered input/output tiles + accumulator + bias + headroom.
    vmem = (2 * (tm * tk * a.dtype.itemsize
                 + tk * f_out_p * xw.dtype.itemsize
                 + tm * f_out_p * out_isz)
            + tm * f_out_p * 4 + f_out_p * 4 + (4 << 20))
    kernel = functools.partial(aggregate_kernel, apply_relu=apply_relu)
    return pl.pallas_call(
        kernel,
        out_shape=jax.ShapeDtypeStruct((n_p, f_out_p), out_dtype),
        grid_spec=pltpu.PrefetchScalarGridSpec(
            num_scalar_prefetch=0,
            grid=(n_p // tm, n_p // tk),
            in_specs=[
                pl.BlockSpec((tm, tk), lambda i, k: (i, k)),          # A_hat tile
                pl.BlockSpec((tk, f_out_p), lambda i, k: (k, 0)),     # XW slab
                pl.BlockSpec((1, f_out_p), lambda i, k: (0, 0)),      # resident bias
            ],
            out_specs=pl.BlockSpec((tm, f_out_p), lambda i, k: (i, 0)),
            scratch_shapes=[pltpu.VMEM((tm, f_out_p), jnp.float32)],
        ),
        compiler_params=pltpu.CompilerParams(
            dimension_semantics=("parallel", "arbitrary"),
            vmem_limit_bytes=int(vmem),
        ),
        cost_estimate=pl.CostEstimate(
            flops=2 * n_p * n_p * f_out_p,
            transcendentals=0,
            bytes_accessed=(n_p * n_p * a.dtype.itemsize
                            + (n_p // tm) * n_p * f_out_p * xw.dtype.itemsize
                            + n_p * f_out_p * out_isz),
        ),
    )(a, xw, b)


def encoder_forward(a_hat, x, w1, b1, w2, b2, *, tile=512):
    """mu = A_hat @ relu(A_hat @ X @ W1 + b1) @ W2 + b2 (2-layer GCN encoder)."""
    n = x.shape[0]
    f_in, hid = w1.shape
    out_c = w2.shape[1]

    # Lane-dense feature padding; node dim padded to the A tile size.
    f_in_p = _round_up(f_in, LANE)
    hid_p = _round_up(hid, LANE)
    out_p = _round_up(out_c, LANE)
    tile = min(tile, _round_up(n, 256))          # tile is a multiple of 256
    n_p = _round_up(n, tile)

    a_p = _pad2(a_hat, n_p, n_p, jnp.bfloat16)   # bf16 A_hat: halves HBM bytes
    x_p = _pad2(x, n_p, f_in_p)
    w1_p = _pad2(w1, f_in_p, hid_p)
    b1_p = _pad2(b1.reshape(1, -1), 1, hid_p)
    w2_p = _pad2(w2, hid_p, out_p)
    b2_p = _pad2(b2.reshape(1, -1), 1, out_p)

    # Layer 1: XW1 once, then tiled aggregation + ReLU; keep H in bf16.
    xw1 = _transform(x_p, w1_p, tm=tile, out_dtype=jnp.bfloat16)
    h = _aggregate(a_p, xw1, b1_p, tm=tile, tk=tile,
                   apply_relu=True, out_dtype=jnp.bfloat16)

    # Layer 2: HW2 once, then tiled aggregation (mu head, f32 output).
    hw2 = _transform(h, w2_p, tm=tile, out_dtype=jnp.bfloat16)
    mu = _aggregate(a_p, hw2, b2_p, tm=tile, tk=tile,
                    apply_relu=False, out_dtype=jnp.float32)

    return mu[:n, :out_c]


# ------------------------------------------------------------ graph builder --

def gcn_normalized_adjacency(edge_index, num_nodes):
    """Dense D^-1/2 (A + I) D^-1/2 matching torch_geometric GCNConv gcn_norm."""
    # TODO(synk): for realistic sparse graphs, replace the dense A_hat with a
    # CSR scalar-prefetch gather (PrefetchScalarGridSpec) so HBM traffic is O(E).
    src = edge_index[0]
    dst = edge_index[1]
    a = jnp.zeros((num_nodes, num_nodes), jnp.float32).at[dst, src].add(1.0)
    a = a + jnp.eye(num_nodes, dtype=jnp.float32)           # add self-loops
    deg = a.sum(axis=1)
    d_inv_sqrt = jnp.where(deg > 0, 1.0 / jnp.sqrt(deg), 0.0)
    return d_inv_sqrt[:, None] * a * d_inv_sqrt[None, :]


def glorot(key, shape):
    fan_in, fan_out = shape
    limit = jnp.sqrt(6.0 / (fan_in + fan_out))
    return jax.random.uniform(key, shape, jnp.float32, -limit, limit)


if __name__ == "__main__":
    # Small deterministic problem: N=512 nodes, in=4, hidden=32, out=16.
    N, IN_C, HID_C, OUT_C = 512, 4, 32, 16

    key = jax.random.PRNGKey(0)
    k_x, k_w1, k_w2 = jax.random.split(key, 3)

    # Node features [N, IN_C]
    x = jax.random.normal(k_x, (N, IN_C), jnp.float32)

    # Deterministic bidirectional ring graph: edge_index [2, 2N]
    idx = jnp.arange(N, dtype=jnp.int32)
    src = jnp.concatenate([idx, (idx + 1) % N])
    dst = jnp.concatenate([(idx + 1) % N, idx])
    edge_index = jnp.stack([src, dst])

    # GCNConv params: glorot weights, zero biases (PyG defaults).
    w1 = glorot(k_w1, (IN_C, HID_C))
    b1 = jnp.zeros((HID_C,), jnp.float32)
    w2 = glorot(k_w2, (HID_C, OUT_C))
    b2 = jnp.zeros((OUT_C,), jnp.float32)

    # Graph -> dense normalized adjacency (plain-JAX glue).
    a_hat = gcn_normalized_adjacency(edge_index, N)

    mu = encoder_forward(a_hat, x, w1, b1, w2, b2)
    mu = jax.block_until_ready(mu)

    # Pure-JAX f32 reference (kernel uses bf16 A_hat / H => relaxed tolerance).
    h_ref = jnp.maximum(a_hat @ (x @ w1) + b1[None, :], 0.0)
    mu_ref = a_hat @ (h_ref @ w2) + b2[None, :]
    assert mu.shape == (N, OUT_C)
    max_err = float(jnp.max(jnp.abs(mu - mu_ref)))
    assert jnp.allclose(mu, mu_ref, atol=5e-2, rtol=5e-2), f"max abs err {max_err}"

    print("KERNEL_OK")
</pallas_src>

<mosaic_0001>
module attributes {stable_mosaic.version = 11 : i64} {
  func.func @transform_kernel(%arg0: i32, %arg1: memref<512x128xf32, #tpu.memory_space<vmem>>, %arg2: memref<128x128xf32, #tpu.memory_space<vmem>>, %arg3: memref<512x128xbf16, #tpu.memory_space<vmem>>) attributes {dimension_semantics = [#tpu.dimension_semantics<parallel>], iteration_bounds = array<i64: 1>, scalar_prefetch = 0 : i64, scratch_operands = 0 : i64, tpu.core_type = #tpu.core_type<tc>, window_params = [{transform_indices = @transform_0, window_bounds = array<i64: 512, 128>}, {pipeline_mode = #tpu.pipeline_mode<synchronous>, transform_indices = @transform_1, window_bounds = array<i64: 128, 128>}, {transform_indices = @transform_2, window_bounds = array<i64: 512, 128>}]} {
    %c0 = arith.constant 0 : index
    %c0_0 = arith.constant 0 : index
    %0 = vector.load %arg1[%c0, %c0_0] : memref<512x128xf32, #tpu.memory_space<vmem>>, vector<512x128xf32>
    %c0_1 = arith.constant 0 : index
    %c0_2 = arith.constant 0 : index
    %1 = vector.load %arg2[%c0_1, %c0_2] : memref<128x128xf32, #tpu.memory_space<vmem>>, vector<128x128xf32>
    %cst = arith.constant dense<0.000000e+00> : vector<512x128xf32>
    %2 = tpu.matmul %0, %1, %cst {dimension_numbers = #tpu.dot_dimension_numbers<[1], [0], [0], [1], [0, 0, 1, 1], [], []>} : vector<512x128xf32>, vector<128x128xf32>, vector<512x128xf32> -> vector<512x128xf32>
    %3 = arith.truncf %2 : vector<512x128xf32> to vector<512x128xbf16>
    %c0_3 = arith.constant 0 : index
    %c0_4 = arith.constant 0 : index
    %4 = vector.load %arg3[%c0_3, %c0_4] : memref<512x128xbf16, #tpu.memory_space<vmem>>, vector<512x128xbf16>
    tpu.vector_store %arg3[%c0_3, %c0_4], %3 {strides = array<i32>} : memref<512x128xbf16, #tpu.memory_space<vmem>>, vector<512x128xbf16>,
    return
  }
  func.func @transform_0(%arg0: i32) -> (i32, i32) {
    %c0_i32 = arith.constant 0 : i32
    %c0_i32_0 = arith.constant 0 : i32
    return %arg0, %c0_i32 : i32, i32
  }
  func.func @transform_1(%arg0: i32) -> (i32, i32) {
    %c0_i32 = arith.constant 0 : i32
    %c0_i32_0 = arith.constant 0 : i32
    %c0_i32_1 = arith.constant 0 : i32
    return %c0_i32, %c0_i32_0 : i32, i32
  }
  func.func @transform_2(%arg0: i32) -> (i32, i32) {
    %c0_i32 = arith.constant 0 : i32
    %c0_i32_0 = arith.constant 0 : i32
    return %arg0, %c0_i32 : i32, i32
  }
}

</mosaic_0001>

<bundles_post_ra>
// kernel: tpu_custom_call.1
= control target key start
LH: loop header
LB: loop body
LE: loop exit
PB: predicated region body
PF: predicated region fallthrough
CT: control target
= control target key end

     0   :  { %7 = vsyncpa [#allocation3], 0  ;;  %s1555_s0 = inlined_call_operand.hbm [shape: f32[512,128], index: 0, kind: input, shape index: {}]   ;;  %s1556_s1 = inlined_call_operand.hbm [shape: f32[128,128], index: 1, kind: input, shape index: {}]   ;;  %s1557_s2 = inlined_call_operand.hbm [shape: bf16[512,128], index: 2, kind: output, shape index: {}]  }
   0x1   :  { %8 = vsyncpa [#allocation6], 0 }
   0x2   :  { %9 = vsyncpa [#allocation4], 0  ;;  %s1497_s9 = smov [#allocation2]   ;;  %s1425_s13 = scalar_lea.hbm %s1555_s0, 8192 }
   0x3   :  { %s15_s10 = sshll.u32 %s1497_s9, 4  ;;  %p1426_p0 = scmp.ne.s32.totalorder %s1555_s0, %s1425_s13  ;;  %s16_s10 = int_to_ptr.vmem [resolvable:$true] %s15_s10 }
   0x4   :  { %p1429_p1 = scmp.lt.u32.totalorder %s1425_s13, %s1555_s0 }
   0x6   :  { %p1431_p2 = pnand %p1429_p1, %p1426_p0 }
   0x8   :  { %1434 = shalt.err (!%p1431_p2)
}
   0x9   :  { %s1435_s18 = scalar_lea.vmem %s16_s10, 8192  ;;  %p1440_p4 = scmp.lt.s32.totalorder %s16_s10, %s16_s10 }
   0xa   :  { %p1436_p3 = scmp.ne.s32.totalorder %s16_s10, %s1435_s18  ;;  %p1441_p5 = scmp.lt.s32.totalorder %s1435_s18, %s1435_s18 }
   0xc   :  { %p1442_p6 = por %p1441_p5, %p1440_p4 }
   0xe   :  { %p1443_p7 = pnand %p1442_p6, %p1436_p3 }
  0x10   :  { %1446 = shalt.err (!%p1443_p7)
}
  0x11   :  { %s1498_s19 = smov 128   ;;  %s1499_s20 = smov 8  }
  0x12   :  { %21 = dma.hbm_to_vmem [thread:$0]  %s1555_s0, 8192, %s16_s10, [#allocation3], %s1498_s19, %s1498_s19, %s1499_s20  }
  0x13   :  { %s1500_s23 = smov [#allocation5]   ;;  %s1447_s27 = scalar_lea.hbm %s1556_s1, 2048 }
  0x14   :  { %s27_s24 = sshll.u32 %s1500_s23, 4  ;;  %p1448_p8 = scmp.ne.s32.totalorder %s1556_s1, %s1447_s27  ;;  %s28_s24 = int_to_ptr.vmem [resolvable:$true] %s27_s24 }
  0x15   :  { %p1451_p9 = scmp.lt.u32.totalorder %s1447_s27, %s1556_s1 }
  0x17   :  { %p1453_p10 = pnand %p1451_p9, %p1448_p8 }
  0x19   :  { %1456 = shalt.err (!%p1453_p10)
}
  0x1a   :  { %s1457_s4 = scalar_lea.vmem %s28_s24, 2048  ;;  %p1462_p12 = scmp.lt.s32.totalorder %s28_s24, %s28_s24 }
  0x1b   :  { %p1458_p11 = scmp.ne.s32.totalorder %s28_s24, %s1457_s4  ;;  %p1463_p13 = scmp.lt.s32.totalorder %s1457_s4, %s1457_s4 }
  0x1d   :  { %p1464_p0 = por %p1463_p13, %p1462_p12 }
  0x1f   :  { %p1465_p1 = pnand %p1464_p0, %p1458_p11 }
  0x21   :  { %1468 = shalt.err (!%p1465_p1)
}
  0x22   :  { %33 = dma.hbm_to_vmem [thread:$0]  %s1556_s1, 2048, %s28_s24, [#allocation6], %s1498_s19, %s1498_s19, %s1499_s20  }
  0x23   :  { %1491 = dma.done.wait [#allocation3], 8192  }
  0x24   :  { %1492 = vsyncadd [#allocation3], 4294959104 }
  0x25   :  { %1493 = dma.done.wait [#allocation6], 2048  }
  0x26   :  { %1494 = vsyncadd [#allocation6], 4294965248  ;;  %v104_v0 = vld [vmem:[#allocation5] sm:$0xff]  ;;  %v105_v1 = vld [vmem:[#allocation5 + $0x8] sm:$0xff]  ;;  %s1501_s1 = smov [#allocation7]  }
  0x27   :  { %v106_v2 = vld [vmem:[#allocation5 + $0x10] sm:$0xff]  ;;  %v1370_v3 = vpack.c.bf16 %v105_v1, %v104_v0  ;;  %v107_v4 = vld [vmem:[#allocation5 + $0x18] sm:$0xff]  ;;  %v108_v6 = vld [vmem:[#allocation5 + $0x20] sm:$0xff]  ;;  %s830_s6 = sshll.u32 %s1501_s1, 4  ;;  %s831_s6 = int_to_ptr.vmem [resolvable:$true] %s830_s6 }
  0x28   :  { %v1374_v5 = vpack.c.bf16 %v107_v4, %v106_v2  ;;  %v109_v7 = vld [vmem:[#allocation5 + $0x28] sm:$0xff]  ;;  %v40_v9 = vld [vmem:[#allocation2] sm:$0xff]  ;;  %v110_v11 = vld [vmem:[#allocation5 + $0x30] sm:$0xff]  ;;  %s1469_s7 = scalar_lea.vmem %s831_s6, 4096  ;;  %p1474_p3 = scmp.lt.s32.totalorder %s831_s6, %s831_s6 }
  0x29   :  { %1371 = vmatprep.subr.bf16.mxu0 %v1370_v3  ;;  %1402 = vmatprep.subr.bf16.mxu1 %v1370_v3  ;;  %v1378_v8 = vpack.c.bf16 %v109_v7, %v108_v6  ;;  %v72_v10 = vld [vmem:[#allocation2 + $0x100] sm:$0xff]  ;;  %v111_v12 = vld [vmem:[#allocation5 + $0x38] sm:$0xff]  ;;  %v113_v15 = vld [vmem:[#allocation5 + $0x48] sm:$0xff]  ;;  %p1470_p2 = scmp.ne.s32.totalorder %s831_s6, %s1469_s7  ;;  %p1475_p4 = scmp.lt.s32.totalorder %s1469_s7, %s1469_s7 }
  0x2a   :  { %1373 = vmatpush3.bf16.msra.mxu0 %v1370_v3  ;;  %1410 = vmatpush3.bf16.msra.mxu1 %v1370_v3  ;;  %v1382_v13 = vpack.c.bf16 %v111_v12, %v110_v11  ;;  %v112_v14 = vld [vmem:[#allocation5 + $0x40] sm:$0xff]  ;;  %v114_v17 = vld [vmem:[#allocation5 + $0x50] sm:$0xff]  ;;  %v115_v18 = vld [vmem:[#allocation5 + $0x58] sm:$0xff] }
  0x2b   :  { %1375 = vmatprep.subr.bf16.mxu0 %v1374_v5  ;;  %1403 = vmatprep.subr.bf16.mxu1 %v1374_v5  ;;  %v1386_v16 = vpack.c.bf16 %v113_v15, %v112_v14  ;;  %v1390_v19 = vpack.c.bf16 %v115_v18, %v114_v17  ;;  %v116_v20 = vld [vmem:[#allocation5 + $0x60] sm:$0xff]  ;;  %v117_v21 = vld [vmem:[#allocation5 + $0x68] sm:$0xff]  ;;  %v118_v23 = vld [vmem:[#allocation5 + $0x70] sm:$0xff]  ;;  %p1476_p5 = por %p1475_p4, %p1474_p3 }
  0x2c   :  { %1274 = vmatprep.mubr.f32.mxu0 %v40_v9  ;;  %1322 = vmatprep.mubr.f32.mxu1 %v72_v10  ;;  %v1394_v22 = vpack.c.bf16 %v117_v21, %v116_v20  ;;  %v119_v24 = vld [vmem:[#allocation5 + $0x78] sm:$0xff]  ;;  %v41_v26 = vld [vmem:[#allocation2 + $0x8] sm:$0xff]  ;;  %v42_v28 = vld [vmem:[#allocation2 + $0x10] sm:$0xff] }
  0x2d   :  { %v1398_v25 = vpack.c.bf16 %v119_v24, %v118_v23  ;;  %v73_v27 = vld [vmem:[#allocation2 + $0x108] sm:$0xff]  ;;  %v74_v29 = vld [vmem:[#allocation2 + $0x110] sm:$0xff]  ;;  %v43_v30 = vld [vmem:[#allocation2 + $0x18] sm:$0xff]  ;;  %p1477_p6 = pnand %p1476_p5, %p1470_p2 }
  0x2e   :  { %1377 = vmatpush3.bf16.msra.mxu0 %v1374_v5  ;;  %1411 = vmatpush3.bf16.msra.mxu1 %v1374_v5  ;;  %v75_v31 = vld [vmem:[#allocation2 + $0x118] sm:$0xff]  ;;  %v44_v32 = vld [vmem:[#allocation2 + $0x20] sm:$0xff]  ;;  %v45_v34 = vld [vmem:[#allocation2 + $0x28] sm:$0xff] }
  0x2f   :  { %1379 = vmatprep.subr.bf16.mxu0 %v1378_v8  ;;  %1404 = vmatprep.subr.bf16.mxu1 %v1378_v8  ;;  %v76_v33 = vld [vmem:[#allocation2 + $0x120] sm:$0xff]  ;;  %v77_v35 = vld [vmem:[#allocation2 + $0x128] sm:$0xff]  ;;  %v46_v36 = vld [vmem:[#allocation2 + $0x30] sm:$0xff] }
  0x30   :  { %v78_v37 = vld [vmem:[#allocation2 + $0x130] sm:$0xff]  ;;  %v47_v38 = vld [vmem:[#allocation2 + $0x38] sm:$0xff]  ;;  %v48_v40 = vld [vmem:[#allocation2 + $0x40] sm:$0xff] }
  0x31   :  { %v79_v39 = vld [vmem:[#allocation2 + $0x138] sm:$0xff]  ;;  %v80_v41 = vld [vmem:[#allocation2 + $0x140] sm:$0xff]  ;;  %v49_v42 = vld [vmem:[#allocation2 + $0x48] sm:$0xff] }
  0x32   :  { %1381 = vmatpush3.bf16.msra.mxu0 %v1378_v8  ;;  %1412 = vmatpush3.bf16.msra.mxu1 %v1378_v8  ;;  %v81_v43 = vld [vmem:[#allocation2 + $0x148] sm:$0xff]  ;;  %v50_v44 = vld [vmem:[#allocation2 + $0x50] sm:$0xff]  ;;  %v51_v46 = vld [vmem:[#allocation2 + $0x58] sm:$0xff] }
  0x33   :  { %1383 = vmatprep.subr.bf16.mxu0 %v1382_v13  ;;  %1405 = vmatprep.subr.bf16.mxu1 %v1382_v13  ;;  %v82_v45 = vld [vmem:[#allocation2 + $0x150] sm:$0xff]  ;;  %v83_v47 = vld [vmem:[#allocation2 + $0x158] sm:$0xff]  ;;  %v52_v48 = vld [vmem:[#allocation2 + $0x60] sm:$0xff] }
  0x34   :  { %v84_v49 = vld [vmem:[#allocation2 + $0x160] sm:$0xff]  ;;  %v53_v50 = vld [vmem:[#allocation2 + $0x68] sm:$0xff]  ;;  %v54_v52 = vld [vmem:[#allocation2 + $0x70] sm:$0xff] }
  0x35   :  { %v85_v51 = vld [vmem:[#allocation2 + $0x168] sm:$0xff]  ;;  %v86_v53 = vld [vmem:[#allocation2 + $0x170] sm:$0xff]  ;;  %v55_v54 = vld [vmem:[#allocation2 + $0x78] sm:$0xff] }
  0x36   :  { %1385 = vmatpush3.bf16.msra.mxu0 %v1382_v13  ;;  %1413 = vmatpush3.bf16.msra.mxu1 %v1382_v13  ;;  %v87_v55 = vld [vmem:[#allocation2 + $0x178] sm:$0xff]  ;;  %v56_v56 = vld [vmem:[#allocation2 + $0x80] sm:$0xff]  ;;  %v57_v58 = vld [vmem:[#allocation2 + $0x88] sm:$0xff] }
  0x37   :  { %1387 = vmatprep.subr.bf16.mxu0 %v1386_v16  ;;  %1406 = vmatprep.subr.bf16.mxu1 %v1386_v16  ;;  %v88_v57 = vld [vmem:[#allocation2 + $0x180] sm:$0xff]  ;;  %v89_v59 = vld [vmem:[#allocation2 + $0x188] sm:$0xff]  ;;  %v58_v60 = vld [vmem:[#allocation2 + $0x90] sm:$0xff] }
  0x38   :  { %v90_v61 = vld [vmem:[#allocation2 + $0x190] sm:$0xff]  ;;  %v59_v62 = vld [vmem:[#allocation2 + $0x98] sm:$0xff]  ;;  %v60_v0 = vld [vmem:[#allocation2 + $0xa0] sm:$0xff] }
  0x39   :  { %v91_v63 = vld [vmem:[#allocation2 + $0x198] sm:$0xff]  ;;  %v92_v1 = vld [vmem:[#allocation2 + $0x1a0] sm:$0xff]  ;;  %v61_v2 = vld [vmem:[#allocation2 + $0xa8] sm:$0xff] }
  0x3a   :  { %1389 = vmatpush3.bf16.msra.mxu0 %v1386_v16  ;;  %1414 = vmatpush3.bf16.msra.mxu1 %v1386_v16  ;;  %v93_v3 = vld [vmem:[#allocation2 + $0x1a8] sm:$0xff]  ;;  %v62_v4 = vld [vmem:[#allocation2 + $0xb0] sm:$0xff]  ;;  %v63_v6 = vld [vmem:[#allocation2 + $0xb8] sm:$0xff] }
  0x3b   :  { %1391 = vmatprep.subr.bf16.mxu0 %v1390_v19  ;;  %1407 = vmatprep.subr.bf16.mxu1 %v1390_v19  ;;  %v94_v5 = vld [vmem:[#allocation2 + $0x1b0] sm:$0xff]  ;;  %v95_v7 = vld [vmem:[#allocation2 + $0x1b8] sm:$0xff]  ;;  %v64_v8 = vld [vmem:[#allocation2 + $0xc0] sm:$0xff] }
  0x3c   :  { %v96_v9 = vld [vmem:[#allocation2 + $0x1c0] sm:$0xff]  ;;  %v65_v10 = vld [vmem:[#allocation2 + $0xc8] sm:$0xff]  ;;  %v66_v12 = vld [vmem:[#allocation2 + $0xd0] sm:$0xff] }
  0x3d   :  { %v97_v11 = vld [vmem:[#allocation2 + $0x1c8] sm:$0xff]  ;;  %v98_v13 = vld [vmem:[#allocation2 + $0x1d0] sm:$0xff]  ;;  %v67_v14 = vld [vmem:[#allocation2 + $0xd8] sm:$0xff] }
  0x3e   :  { %1393 = vmatpush3.bf16.msra.mxu0 %v1390_v19  ;;  %1415 = vmatpush3.bf16.msra.mxu1 %v1390_v19  ;;  %v99_v15 = vld [vmem:[#allocation2 + $0x1d8] sm:$0xff]  ;;  %v68_v16 = vld [vmem:[#allocation2 + $0xe0] sm:$0xff]  ;;  %v69_v18 = vld [vmem:[#allocation2 + $0xe8] sm:$0xff] }
  0x3f   :  { %1395 = vmatprep.subr.bf16.mxu0 %v1394_v22  ;;  %1408 = vmatprep.subr.bf16.mxu1 %v1394_v22  ;;  %v100_v17 = vld [vmem:[#allocation2 + $0x1e0] sm:$0xff]  ;;  %v101_v19 = vld [vmem:[#allocation2 + $0x1e8] sm:$0xff]  ;;  %v70_v20 = vld [vmem:[#allocation2 + $0xf0] sm:$0xff] }
  0x40   :  { %v102_v21 = vld [vmem:[#allocation2 + $0x1f0] sm:$0xff]  ;;  %v103_v23 = vld [vmem:[#allocation2 + $0x1f8] sm:$0xff] }
  0x42   :  { %1397 = vmatpush3.bf16.msra.mxu0 %v1394_v22  ;;  %1416 = vmatpush3.bf16.msra.mxu1 %v1394_v22  ;;  %v71_v22 = vld [vmem:[#allocation2 + $0xf8] sm:$0xff] }
  0x43   :  { %1399 = vmatprep.subr.bf16.mxu0 %v1398_v25  ;;  %1409 = vmatprep.subr.bf16.mxu1 %v1398_v25 }
  0x46   :  { %1401 = vmatpush3.bf16.msra.mxu0 %v1398_v25  ;;  %1417 = vmatpush3.bf16.msra.mxu1 %v1398_v25 }
  0x49   :  { %1275 = vmatmul.mubr.f32.vlgmr.msra.gmra.mrb[0].mxu0 %v41_v26  ;;  %1323 = vmatmul.mubr.f32.vlgmr.msra.gmra.mrb[0].mxu1 %v73_v27 }
  0x4a   :  { %1277 = vmatprep.mubr.f32.mxu0 %v42_v28  ;;  %1325 = vmatprep.mubr.f32.mxu1 %v74_v29 }
  0x4d   :  { %1278 = vmatmul.mubr.f32.gmra.mrb[2].mxu0 %v43_v30  ;;  %1326 = vmatmul.mubr.f32.gmra.mrb[2].mxu1 %v75_v31 }
  0x4e   :  { %1280 = vmatprep.mubr.f32.mxu0 %v44_v32  ;;  %1328 = vmatprep.mubr.f32.mxu1 %v76_v33 }
  0x51   :  { %1281 = vmatmul.mubr.f32.gmra.mrb[4].mxu0 %v45_v34  ;;  %1329 = vmatmul.mubr.f32.gmra.mrb[4].mxu1 %v77_v35 }
  0x52   :  { %1283 = vmatprep.mubr.f32.mxu0 %v46_v36  ;;  %1331 = vmatprep.mubr.f32.mxu1 %v78_v37 }
  0x55   :  { %1284 = vmatmul.mubr.f32.gmra.mrb[6].mxu0 %v47_v38  ;;  %1332 = vmatmul.mubr.f32.gmra.mrb[6].mxu1 %v79_v39 }
  0x56   :  { %1286 = vmatprep.mubr.f32.mxu0 %v48_v40  ;;  %1334 = vmatprep.mubr.f32.mxu1 %v80_v41 }
  0x59   :  { %1287 = vmatmul.mubr.f32.gmra.mrb[8].mxu0 %v49_v42  ;;  %1335 = vmatmul.mubr.f32.gmra.mrb[8].mxu1 %v81_v43 }
  0x5a   :  { %1289 = vmatprep.mubr.f32.mxu0 %v50_v44  ;;  %1337 = vmatprep.mubr.f32.mxu1 %v82_v45 }
  0x5d   :  { %1290 = vmatmul.mubr.f32.gmra.mrb[10].mxu0 %v51_v46  ;;  %1338 = vmatmul.mubr.f32.gmra.mrb[10].mxu1 %v83_v47 }
  0x5e   :  { %1292 = vmatprep.mubr.f32.mxu0 %v52_v48  ;;  %1340 = vmatprep.mubr.f32.mxu1 %v84_v49 }
  0x61   :  { %1293 = vmatmul.mubr.f32.gmra.mrb[12].mxu0 %v53_v50  ;;  %1341 = vmatmul.mubr.f32.gmra.mrb[12].mxu1 %v85_v51 }
  0x62   :  { %1295 = vmatprep.mubr.f32.mxu0 %v54_v52  ;;  %1343 = vmatprep.mubr.f32.mxu1 %v86_v53 }
  0x65   :  { %1296 = vmatmul.mubr.f32.gmra.mrb[14].mxu0 %v55_v54  ;;  %1344 = vmatmul.mubr.f32.gmra.mrb[14].mxu1 %v87_v55 }
  0x66   :  { %1298 = vmatprep.mubr.f32.mxu0 %v56_v56  ;;  %1346 = vmatprep.mubr.f32.mxu1 %v88_v57 }
  0x69   :  { %1299 = vmatmul.mubr.f32.gmra.mrb[16].mxu0 %v57_v58  ;;  %1347 = vmatmul.mubr.f32.gmra.mrb[16].mxu1 %v89_v59 }
  0x6a   :  { %1301 = vmatprep.mubr.f32.mxu0 %v58_v60  ;;  %1349 = vmatprep.mubr.f32.mxu1 %v90_v61 }
  0x6d   :  { %1302 = vmatmul.mubr.f32.gmra.mrb[18].mxu0 %v59_v62  ;;  %1350 = vmatmul.mubr.f32.gmra.mrb[18].mxu1 %v91_v63 }
  0x6e   :  { %1304 = vmatprep.mubr.f32.mxu0 %v60_v0  ;;  %1352 = vmatprep.mubr.f32.mxu1 %v92_v1 }
  0x71   :  { %1305 = vmatmul.mubr.f32.gmra.mrb[20].mxu0 %v61_v2  ;;  %1353 = vmatmul.mubr.f32.gmra.mrb[20].mxu1 %v93_v3 }
  0x72   :  { %1307 = vmatprep.mubr.f32.mxu0 %v62_v4  ;;  %1355 = vmatprep.mubr.f32.mxu1 %v94_v5 }
  0x75   :  { %1308 = vmatmul.mubr.f32.gmra.mrb[22].mxu0 %v63_v6  ;;  %1356 = vmatmul.mubr.f32.gmra.mrb[22].mxu1 %v95_v7 }
  0x76   :  { %1310 = vmatprep.mubr.f32.mxu0 %v64_v8  ;;  %1358 = vmatprep.mubr.f32.mxu1 %v96_v9 }
  0x79   :  { %1311 = vmatmul.mubr.f32.gmra.mrb[24].mxu0 %v65_v10  ;;  %1359 = vmatmul.mubr.f32.gmra.mrb[24].mxu1 %v97_v11 }
  0x7a   :  { %1313 = vmatprep.mubr.f32.mxu0 %v66_v12  ;;  %1361 = vmatprep.mubr.f32.mxu1 %v98_v13 }
  0x7d   :  { %1314 = vmatmul.mubr.f32.gmra.mrb[26].mxu0 %v67_v14  ;;  %1362 = vmatmul.mubr.f32.gmra.mrb[26].mxu1 %v99_v15 }
  0x7e   :  { %1316 = vmatprep.mubr.f32.mxu0 %v68_v16  ;;  %1364 = vmatprep.mubr.f32.mxu1 %v100_v17 }
  0x81   :  { %1317 = vmatmul.mubr.f32.gmra.mrb[28].mxu0 %v69_v18  ;;  %1365 = vmatmul.mubr.f32.gmra.mrb[28].mxu1 %v101_v19 }
  0x82   :  { %1319 = vmatprep.mubr.f32.mxu0 %v70_v20  ;;  %1367 = vmatprep.mubr.f32.mxu1 %v102_v21 }
  0x85   :  { %1320 = vmatmul.mubr.f32.gmra.mrb[30].mxu0 %v71_v22  ;;  %1368 = vmatmul.mubr.f32.gmra.mrb[30].mxu1 %v103_v23 }
 0x11c   :  { %v1276_v24 = vpop.f32.mrb[0].mxu0  ;;  %v1324_v25 = vpop.f32.mrb[0].mxu1 }
 0x11d   :  { %v186_v26 = vpop.f32.mrb[1].mxu0  ;;  %v346_v27 = vpop.f32.mrb[1].mxu1 }
 0x11e   :  { %v974_v28 = vpack.c.bf16 %v1276_v24, %v186_v26  ;;  %v1054_v29 = vpack.c.bf16 %v1324_v25, %v346_v27 }
 0x120   :  { %975 = vst [vmem:[#allocation7] sm:$0xff] %v974_v28   ;;  %1146 = vst [vmem:[#allocation7 + $0x80] sm:$0xff] %v1054_v29   ;;  %v1279_v30 = vpop.f32.mrb[2].mxu0  ;;  %v1327_v31 = vpop.f32.mrb[2].mxu1 }
 0x121   :  { %v196_v32 = vpop.f32.mrb[3].mxu0  ;;  %v356_v33 = vpop.f32.mrb[3].mxu1 }
 0x122   :  { %v979_v34 = vpack.c.bf16 %v1279_v30, %v196_v32  ;;  %v1059_v35 = vpack.c.bf16 %v1327_v31, %v356_v33 }
 0x124   :  { %1131 = vst [vmem:[#allocation7 + $0x8] sm:$0xff] %v979_v34   ;;  %1147 = vst [vmem:[#allocation7 + $0x88] sm:$0xff] %v1059_v35   ;;  %v1282_v36 = vpop.f32.mrb[4].mxu0  ;;  %v1330_v37 = vpop.f32.mrb[4].mxu1 }
 0x125   :  { %v206_v38 = vpop.f32.mrb[5].mxu0  ;;  %v366_v39 = vpop.f32.mrb[5].mxu1 }
 0x126   :  { %v984_v40 = vpack.c.bf16 %v1282_v36, %v206_v38  ;;  %v1064_v41 = vpack.c.bf16 %v1330_v37, %v366_v39 }
 0x128   :  { %1132 = vst [vmem:[#allocation7 + $0x10] sm:$0xff] %v984_v40   ;;  %1148 = vst [vmem:[#allocation7 + $0x90] sm:$0xff] %v1064_v41   ;;  %v1285_v42 = vpop.f32.mrb[6].mxu0  ;;  %v1333_v43 = vpop.f32.mrb[6].mxu1 }
 0x129   :  { %v216_v44 = vpop.f32.mrb[7].mxu0  ;;  %v376_v45 = vpop.f32.mrb[7].mxu1 }
 0x12a   :  { %v989_v46 = vpack.c.bf16 %v1285_v42, %v216_v44  ;;  %v1069_v47 = vpack.c.bf16 %v1333_v43, %v376_v45 }
 0x12c   :  { %1133 = vst [vmem:[#allocation7 + $0x18] sm:$0xff] %v989_v46   ;;  %1149 = vst [vmem:[#allocation7 + $0x98] sm:$0xff] %v1069_v47   ;;  %v1288_v48 = vpop.f32.mrb[8].mxu0  ;;  %v1336_v49 = vpop.f32.mrb[8].mxu1 }
 0x12d   :  { %v226_v50 = vpop.f32.mrb[9].mxu0  ;;  %v386_v51 = vpop.f32.mrb[9].mxu1 }
 0x12e   :  { %v994_v52 = vpack.c.bf16 %v1288_v48, %v226_v50  ;;  %v1074_v53 = vpack.c.bf16 %v1336_v49, %v386_v51 }
 0x130   :  { %1134 = vst [vmem:[#allocation7 + $0x20] sm:$0xff] %v994_v52   ;;  %1150 = vst [vmem:[#allocation7 + $0xa0] sm:$0xff] %v1074_v53   ;;  %v1291_v54 = vpop.f32.mrb[10].mxu0  ;;  %v1339_v55 = vpop.f32.mrb[10].mxu1 }
 0x131   :  { %v236_v56 = vpop.f32.mrb[11].mxu0  ;;  %v396_v57 = vpop.f32.mrb[11].mxu1 }
 0x132   :  { %v999_v58 = vpack.c.bf16 %v1291_v54, %v236_v56  ;;  %v1079_v59 = vpack.c.bf16 %v1339_v55, %v396_v57 }
 0x134   :  { %1135 = vst [vmem:[#allocation7 + $0x28] sm:$0xff] %v999_v58   ;;  %1151 = vst [vmem:[#allocation7 + $0xa8] sm:$0xff] %v1079_v59   ;;  %v1294_v60 = vpop.f32.mrb[12].mxu0  ;;  %v1342_v61 = vpop.f32.mrb[12].mxu1 }
 0x135   :  { %v246_v62 = vpop.f32.mrb[13].mxu0  ;;  %v406_v63 = vpop.f32.mrb[13].mxu1 }
 0x136   :  { %v1004_v0 = vpack.c.bf16 %v1294_v60, %v246_v62  ;;  %v1084_v1 = vpack.c.bf16 %v1342_v61, %v406_v63 }
 0x138   :  { %1136 = vst [vmem:[#allocation7 + $0x30] sm:$0xff] %v1004_v0   ;;  %1152 = vst [vmem:[#allocation7 + $0xb0] sm:$0xff] %v1084_v1   ;;  %v1297_v2 = vpop.f32.mrb[14].mxu0  ;;  %v1345_v3 = vpop.f32.mrb[14].mxu1 }
 0x139   :  { %v256_v4 = vpop.f32.mrb[15].mxu0  ;;  %v416_v5 = vpop.f32.mrb[15].mxu1 }
 0x13a   :  { %v1009_v6 = vpack.c.bf16 %v1297_v2, %v256_v4  ;;  %v1089_v7 = vpack.c.bf16 %v1345_v3, %v416_v5 }
 0x13c   :  { %1137 = vst [vmem:[#allocation7 + $0x38] sm:$0xff] %v1009_v6   ;;  %1153 = vst [vmem:[#allocation7 + $0xb8] sm:$0xff] %v1089_v7   ;;  %v1300_v8 = vpop.f32.mrb[16].mxu0  ;;  %v1348_v9 = vpop.f32.mrb[16].mxu1 }
 0x13d   :  { %v266_v10 = vpop.f32.mrb[17].mxu0  ;;  %v426_v11 = vpop.f32.mrb[17].mxu1 }
 0x13e   :  { %v1014_v12 = vpack.c.bf16 %v1300_v8, %v266_v10  ;;  %v1094_v13 = vpack.c.bf16 %v1348_v9, %v426_v11 }
 0x140   :  { %1138 = vst [vmem:[#allocation7 + $0x40] sm:$0xff] %v1014_v12   ;;  %1154 = vst [vmem:[#allocation7 + $0xc0] sm:$0xff] %v1094_v13   ;;  %v1303_v14 = vpop.f32.mrb[18].mxu0  ;;  %v1351_v15 = vpop.f32.mrb[18].mxu1 }
 0x141   :  { %v276_v16 = vpop.f32.mrb[19].mxu0  ;;  %v436_v17 = vpop.f32.mrb[19].mxu1 }
 0x142   :  { %v1019_v18 = vpack.c.bf16 %v1303_v14, %v276_v16  ;;  %v1099_v19 = vpack.c.bf16 %v1351_v15, %v436_v17 }
 0x144   :  { %1139 = vst [vmem:[#allocation7 + $0x48] sm:$0xff] %v1019_v18   ;;  %1155 = vst [vmem:[#allocation7 + $0xc8] sm:$0xff] %v1099_v19   ;;  %v1306_v20 = vpop.f32.mrb[20].mxu0  ;;  %v1354_v21 = vpop.f32.mrb[20].mxu1 }
 0x145   :  { %v286_v22 = vpop.f32.mrb[21].mxu0  ;;  %v446_v23 = vpop.f32.mrb[21].mxu1 }
 0x146   :  { %v1024_v24 = vpack.c.bf16 %v1306_v20, %v286_v22  ;;  %v1104_v25 = vpack.c.bf16 %v1354_v21, %v446_v23 }
 0x148   :  { %1140 = vst [vmem:[#allocation7 + $0x50] sm:$0xff] %v1024_v24   ;;  %1156 = vst [vmem:[#allocation7 + $0xd0] sm:$0xff] %v1104_v25   ;;  %v1309_v26 = vpop.f32.mrb[22].mxu0  ;;  %v1357_v27 = vpop.f32.mrb[22].mxu1 }
 0x149   :  { %v296_v28 = vpop.f32.mrb[23].mxu0  ;;  %v456_v29 = vpop.f32.mrb[23].mxu1 }
 0x14a   :  { %v1029_v30 = vpack.c.bf16 %v1309_v26, %v296_v28  ;;  %v1109_v31 = vpack.c.bf16 %v1357_v27, %v456_v29 }
 0x14c   :  { %1141 = vst [vmem:[#allocation7 + $0x58] sm:$0xff] %v1029_v30   ;;  %1157 = vst [vmem:[#allocation7 + $0xd8] sm:$0xff] %v1109_v31   ;;  %v1312_v32 = vpop.f32.mrb[24].mxu0  ;;  %v1360_v33 = vpop.f32.mrb[24].mxu1 }
 0x14d   :  { %v306_v34 = vpop.f32.mrb[25].mxu0  ;;  %v466_v35 = vpop.f32.mrb[25].mxu1 }
 0x14e   :  { %v1034_v36 = vpack.c.bf16 %v1312_v32, %v306_v34  ;;  %v1114_v37 = vpack.c.bf16 %v1360_v33, %v466_v35 }
 0x150   :  { %1142 = vst [vmem:[#allocation7 + $0x60] sm:$0xff] %v1034_v36   ;;  %1158 = vst [vmem:[#allocation7 + $0xe0] sm:$0xff] %v1114_v37   ;;  %v1315_v38 = vpop.f32.mrb[26].mxu0  ;;  %v1363_v39 = vpop.f32.mrb[26].mxu1 }
 0x151   :  { %v316_v40 = vpop.f32.mrb[27].mxu0  ;;  %v476_v41 = vpop.f32.mrb[27].mxu1 }
 0x152   :  { %v1039_v42 = vpack.c.bf16 %v1315_v38, %v316_v40  ;;  %v1119_v43 = vpack.c.bf16 %v1363_v39, %v476_v41 }
 0x154   :  { %1143 = vst [vmem:[#allocation7 + $0x68] sm:$0xff] %v1039_v42   ;;  %1159 = vst [vmem:[#allocation7 + $0xe8] sm:$0xff] %v1119_v43   ;;  %v1318_v44 = vpop.f32.mrb[28].mxu0  ;;  %v1366_v45 = vpop.f32.mrb[28].mxu1 }
 0x155   :  { %v326_v46 = vpop.f32.mrb[29].mxu0  ;;  %v486_v47 = vpop.f32.mrb[29].mxu1 }
 0x156   :  { %v1044_v48 = vpack.c.bf16 %v1318_v44, %v326_v46  ;;  %v1124_v49 = vpack.c.bf16 %v1366_v45, %v486_v47 }
 0x158   :  { %1144 = vst [vmem:[#allocation7 + $0x70] sm:$0xff] %v1044_v48   ;;  %1160 = vst [vmem:[#allocation7 + $0xf0] sm:$0xff] %v1124_v49   ;;  %v1321_v50 = vpop.f32.mrb[30].mxu0  ;;  %v1369_v51 = vpop.f32.mrb[30].mxu1 }
 0x159   :  { %v336_v52 = vpop.f32.mrb[31].mxu0  ;;  %v496_v53 = vpop.f32.mrb[31].mxu1 }
 0x15a   :  { %v1049_v54 = vpack.c.bf16 %v1321_v50, %v336_v52  ;;  %v1129_v55 = vpack.c.bf16 %v1369_v51, %v496_v53 }
 0x15c   :  { %1145 = vst [vmem:[#allocation7 + $0x78] sm:$0xff] %v1049_v54   ;;  %1161 = vst [vmem:[#allocation7 + $0xf8] sm:$0xff] %v1129_v55  }
 0x15d   :  { %1480 = shalt.err (!%p1477_p6)
}
 0x15e   :  { %s1481_s10 = scalar_lea.hbm %s1557_s2, 4096 }
 0x15f   :  { %p1482_p7 = scmp.ne.s32.totalorder %s1557_s2, %s1481_s10  ;;  %p1485_p8 = scmp.lt.u32.totalorder %s1481_s10, %s1557_s2 }
 0x161   :  { %p1487_p9 = pnand %p1485_p8, %p1482_p7 }
 0x163   :  { %1490 = shalt.err (!%p1487_p9)
}
 0x164   :  { %s1502_s15 = smov 64   ;;  %s1503_s16 = smov 4  }
 0x165   :  { %836 = dma.vmem_to_hbm [thread:$0]  %s831_s6, 4096, %s1557_s2, [#allocation4], %s1502_s15, %s1502_s15, %s1503_s16  }
 0x166   :  { %1495 = dma.done.wait [#allocation4], 4096  }
 0x167   :  { %1496 = vsyncadd [#allocation4], 4294963200 }
 0x168   :  { %840 = vsyncpa [#allocation3], 1 }
 0x169   :  { %841 = vsyncpa [#allocation6], 1 }
 0x16a   :  { %842 = vsyncpa [#allocation4], 1 }

</bundles_post_ra>
